<compile_context>
chip_gen: v7x
topology: tpu7x:2x2x1
jax: 0.10.0
libtpu: 0.0.40
codegen_flags: <defaults>
</compile_context>

<pallas_src>
import jax
import jax.numpy as jnp
from jax.experimental import pallas as pl
from jax.experimental.pallas import tpu as pltpu

# Layer widths of the PyTorch module: 1 -> 32 -> 64 -> 128 -> 32 -> 16 -> 1
DIMS = [1, 32, 64, 128, 32, 16, 1]


def mlp_kernel(x_ref,
               w1, b1, w2, b2, w3, b3, w4, b4, w5, b5, w6t, b6,
               o_ref):
    x = x_ref[...]                                    # (1, tb), batch on lanes

    # fc1: in_features == 1 -> broadcast outer product on the VPU
    # (a K=1 matmul would waste an entire padded MXU pass).
    h = jnp.maximum(w1[...] * x + b1[...], 0.0)       # (32, tb) f32

    def dense(h, w_ref, b_ref):                       # (in, tb) -> (out, tb)
        w = w_ref[...]                                # (out, in), f32 or bf16
        y = jnp.dot(w, h.astype(w.dtype),             # MXU, f32 accumulation
                    preferred_element_type=jnp.float32)
        return jnp.maximum(y + b_ref[...], 0.0)       # bias (out, 1), f32 VPU

    h = dense(h, w2, b2)                              # (64,  tb)
    h = dense(h, w3, b3)                              # (128, tb)
    h = dense(h, w4, b4)                              # (32,  tb)
    h = dense(h, w5, b5)                              # (16,  tb)

    # fc6: out_features == 1 -> elementwise multiply + sublane reduce
    # (VPU + XLU slots; avoids an N=1 padded MXU pass). No activation.
    y = jnp.sum(w6t[...] * h, axis=0, keepdims=True) + b6[...]   # (1, tb)
    o_ref[...] = y.astype(o_ref.dtype)


def make_params(key):
    """Deterministic PyTorch-style init: w (out, in), b (out,), U(+/-1/sqrt(fan_in))."""
    params = []
    for i in range(6):
        fan_in, fan_out = DIMS[i], DIMS[i + 1]
        key, kw, kb = jax.random.split(key, 3)
        bound = 1.0 / (fan_in ** 0.5)
        w = jax.random.uniform(kw, (fan_out, fan_in), jnp.float32,
                               minval=-bound, maxval=bound)
        b = jax.random.uniform(kb, (fan_out,), jnp.float32,
                               minval=-bound, maxval=bound)
        params.append((w, b))
    return params


def mlp_forward(x, params, *, block_b=4096, use_bf16=True):
    """x: (B, 1) float32.  params: list of 6 (w, b) pairs in PyTorch layout."""
    B = x.shape[0]

    # Round the requested tile to a lane-dense multiple of 128 (no assert).
    block_b = max(128, (int(block_b) // 128) * 128)

    # Pad the batch to a multiple of 128; padded lanes carry relu(b) garbage
    # through the layers and are sliced off after the kernel (no in-kernel
    # reduction over the batch axis, so this is numerically harmless).
    Bp = pl.cdiv(B, 128) * 128
    tb = min(block_b, Bp)
    # Keep the grid at >= 2 blocks whenever the batch allows it, so the
    # "parallel" axis actually shards across v7x's 2 TensorCores.
    if Bp >= 256:
        tb = min(tb, max(128, (Bp // 2 // 128) * 128))
    Bp = pl.cdiv(Bp, tb) * tb                         # padded batch, multiple of tb

    # Batch on the lane axis: (B, 1) -> (1, Bp) via a single pad (no scatter).
    x_row = x.astype(jnp.float32).reshape(1, B)
    x_t = jnp.pad(x_row, ((0, 0), (0, Bp - B))) if Bp > B else x_row

    # Repack params for the (features, batch) compute layout.  Middle-layer
    # weights go to bf16 by default (f32 accumulation in the kernel); the
    # VPU-handled fc1 / fc6 params and all biases stay f32.
    (w1, b1), (w2, b2), (w3, b3), (w4, b4), (w5, b5), (w6, b6) = params
    mm_dtype = jnp.bfloat16 if use_bf16 else jnp.float32
    flat = [
        w1.reshape(32, 1), b1.reshape(32, 1),         # fc1: VPU outer product
        w2.astype(mm_dtype), b2.reshape(64, 1),
        w3.astype(mm_dtype), b3.reshape(128, 1),
        w4.astype(mm_dtype), b4.reshape(32, 1),
        w5.astype(mm_dtype), b5.reshape(16, 1),
        w6.reshape(16, 1), b6.reshape(1, 1),          # fc6: VPU mul + reduce
    ]

    # All params are tiny (~40 KiB total); constant block index -> DMA'd once
    # and kept resident across the batch grid.
    param_specs = [pl.BlockSpec(p.shape, lambda i: (0, 0)) for p in flat]
    x_spec = pl.BlockSpec((1, tb), lambda i: (0, i))
    o_spec = pl.BlockSpec((1, tb), lambda i: (0, i))   # lane-dense output tile

    # Only touch the VMEM limit when someone pushes tb past 4096 (relevant on
    # v7x, whose scoped default is 32 MiB of 64 MiB physical).
    cp_kwargs = dict(dimension_semantics=("parallel",))
    if tb > 4096:
        cp_kwargs["vmem_limit_bytes"] = 48 * 1024 * 1024
    compiler_params = pltpu.CompilerParams(**cp_kwargs)

    out = pl.pallas_call(
        mlp_kernel,
        out_shape=jax.ShapeDtypeStruct((1, Bp), jnp.float32),
        grid_spec=pltpu.PrefetchScalarGridSpec(
            num_scalar_prefetch=0,
            grid=(Bp // tb,),
            in_specs=[x_spec] + param_specs,
            out_specs=o_spec,
        ),
        compiler_params=compiler_params,
    )(x_t, *flat)

    return out[0, :B].reshape(B, 1)


def mlp_reference(x, params):
    h = x
    for i, (w, b) in enumerate(params):
        h = h @ w.T + b
        if i < 5:
            h = jnp.maximum(h, 0.0)
    return h


if __name__ == "__main__":
    key = jax.random.PRNGKey(0)
    kx, kp = jax.random.split(key)
    params = make_params(kp)

    # --- Small batch, f32 matmul path (tight check vs. reference) ----------
    x = jax.random.normal(kx, (16, 1), jnp.float32)
    ref = mlp_reference(x, params)

    out_f32 = jax.block_until_ready(mlp_forward(x, params, use_bf16=False))
    assert out_f32.shape == (16, 1)
    assert jnp.allclose(out_f32, ref, atol=1e-4, rtol=1e-4), \
        "mismatch vs reference (B=16, f32)"

    # --- Same batch, default bf16 matmul path (looser tolerance) -----------
    out_bf16 = jax.block_until_ready(mlp_forward(x, params))
    assert jnp.allclose(out_bf16, ref, atol=3e-2, rtol=3e-2), \
        "mismatch vs reference (B=16, bf16)"

    # --- Ragged batch + multi-block grid (300 -> padded 384, 3 x 128) ------
    x2 = jax.random.normal(kx, (300, 1), jnp.float32)
    out2 = jax.block_until_ready(mlp_forward(x2, params, block_b=150))  # rounds to 128
    ref2 = mlp_reference(x2, params)
    assert out2.shape == (300, 1)
    assert jnp.allclose(out2, ref2, atol=3e-2, rtol=3e-2), \
        "mismatch vs reference (B=300, bf16)"

    # --- Moderate batch, default tile: exercises jnp.pad + >=2-block cap ---
    x3 = jax.random.normal(kx, (1000, 1), jnp.float32)
    out3 = jax.block_until_ready(mlp_forward(x3, params))
    ref3 = mlp_reference(x3, params)
    assert out3.shape == (1000, 1)
    assert jnp.allclose(out3, ref3, atol=3e-2, rtol=3e-2), \
        "mismatch vs reference (B=1000, bf16)"

    print("KERNEL_OK")
</pallas_src>

<mosaic_0001>
module attributes {stable_mosaic.version = 11 : i64} {
  func.func @mlp_kernel(%arg0: i32, %arg1: memref<1x128xf32, #tpu.memory_space<vmem>>, %arg2: memref<32x1xf32, #tpu.memory_space<vmem>>, %arg3: memref<32x1xf32, #tpu.memory_space<vmem>>, %arg4: memref<64x32xf32, #tpu.memory_space<vmem>>, %arg5: memref<64x1xf32, #tpu.memory_space<vmem>>, %arg6: memref<128x64xf32, #tpu.memory_space<vmem>>, %arg7: memref<128x1xf32, #tpu.memory_space<vmem>>, %arg8: memref<32x128xf32, #tpu.memory_space<vmem>>, %arg9: memref<32x1xf32, #tpu.memory_space<vmem>>, %arg10: memref<16x32xf32, #tpu.memory_space<vmem>>, %arg11: memref<16x1xf32, #tpu.memory_space<vmem>>, %arg12: memref<16x1xf32, #tpu.memory_space<vmem>>, %arg13: memref<1x1xf32, #tpu.memory_space<vmem>>, %arg14: memref<1x128xf32, #tpu.memory_space<vmem>>) attributes {dimension_semantics = [#tpu.dimension_semantics<parallel>], iteration_bounds = array<i64: 1>, scalar_prefetch = 0 : i64, scratch_operands = 0 : i64, tpu.core_type = #tpu.core_type<tc>, window_params = [{transform_indices = @transform_0, window_bounds = array<i64: 1, 128>}, {pipeline_mode = #tpu.pipeline_mode<synchronous>, transform_indices = @transform_1, window_bounds = array<i64: 32, 1>}, {pipeline_mode = #tpu.pipeline_mode<synchronous>, transform_indices = @transform_2, window_bounds = array<i64: 32, 1>}, {pipeline_mode = #tpu.pipeline_mode<synchronous>, transform_indices = @transform_3, window_bounds = array<i64: 64, 32>}, {pipeline_mode = #tpu.pipeline_mode<synchronous>, transform_indices = @transform_4, window_bounds = array<i64: 64, 1>}, {pipeline_mode = #tpu.pipeline_mode<synchronous>, transform_indices = @transform_5, window_bounds = array<i64: 128, 64>}, {pipeline_mode = #tpu.pipeline_mode<synchronous>, transform_indices = @transform_6, window_bounds = array<i64: 128, 1>}, {pipeline_mode = #tpu.pipeline_mode<synchronous>, transform_indices = @transform_7, window_bounds = array<i64: 32, 128>}, {pipeline_mode = #tpu.pipeline_mode<synchronous>, transform_indices = @transform_8, window_bounds = array<i64: 32, 1>}, {pipeline_mode = #tpu.pipeline_mode<synchronous>, transform_indices = @transform_9, window_bounds = array<i64: 16, 32>}, {pipeline_mode = #tpu.pipeline_mode<synchronous>, transform_indices = @transform_10, window_bounds = array<i64: 16, 1>}, {pipeline_mode = #tpu.pipeline_mode<synchronous>, transform_indices = @transform_11, window_bounds = array<i64: 16, 1>}, {pipeline_mode = #tpu.pipeline_mode<synchronous>, transform_indices = @transform_12, window_bounds = array<i64: 1, 1>}, {transform_indices = @transform_13, window_bounds = array<i64: 1, 128>}]} {
    %c0 = arith.constant 0 : index
    %c0_0 = arith.constant 0 : index
    %0 = vector.load %arg1[%c0, %c0_0] : memref<1x128xf32, #tpu.memory_space<vmem>>, vector<1x128xf32>
    %c0_1 = arith.constant 0 : index
    %c0_2 = arith.constant 0 : index
    %1 = vector.load %arg2[%c0_1, %c0_2] : memref<32x1xf32, #tpu.memory_space<vmem>>, vector<32x1xf32>
    %2 = vector.broadcast %1 : vector<32x1xf32> to vector<32x128xf32>
    %3 = vector.broadcast %0 : vector<1x128xf32> to vector<32x128xf32>
    %4 = arith.mulf %2, %3 : vector<32x128xf32>
    %c0_3 = arith.constant 0 : index
    %c0_4 = arith.constant 0 : index
    %5 = vector.load %arg3[%c0_3, %c0_4] : memref<32x1xf32, #tpu.memory_space<vmem>>, vector<32x1xf32>
    %6 = vector.broadcast %5 : vector<32x1xf32> to vector<32x128xf32>
    %7 = arith.addf %4, %6 : vector<32x128xf32>
    %cst = arith.constant 0.000000e+00 : f32
    %8 = vector.broadcast %cst : f32 to vector<32x128xf32>
    %9 = arith.maximumf %7, %8 : vector<32x128xf32>
    %c0_5 = arith.constant 0 : index
    %c0_6 = arith.constant 0 : index
    %10 = vector.load %arg4[%c0_5, %c0_6] : memref<64x32xf32, #tpu.memory_space<vmem>>, vector<64x32xf32>
    %cst_7 = arith.constant dense<0.000000e+00> : vector<64x128xf32>
    %11 = tpu.matmul %10, %9, %cst_7 {dimension_numbers = #tpu.dot_dimension_numbers<[1], [0], [0], [1], [0, 0, 1, 1], [], []>} : vector<64x32xf32>, vector<32x128xf32>, vector<64x128xf32> -> vector<64x128xf32>
    %c0_8 = arith.constant 0 : index
    %c0_9 = arith.constant 0 : index
    %12 = vector.load %arg5[%c0_8, %c0_9] : memref<64x1xf32, #tpu.memory_space<vmem>>, vector<64x1xf32>
    %13 = vector.broadcast %12 : vector<64x1xf32> to vector<64x128xf32>
    %14 = arith.addf %11, %13 : vector<64x128xf32>
    %cst_10 = arith.constant 0.000000e+00 : f32
    %15 = vector.broadcast %cst_10 : f32 to vector<64x128xf32>
    %16 = arith.maximumf %14, %15 : vector<64x128xf32>
    %c0_11 = arith.constant 0 : index
    %c0_12 = arith.constant 0 : index
    %17 = vector.load %arg6[%c0_11, %c0_12] : memref<128x64xf32, #tpu.memory_space<vmem>>, vector<128x64xf32>
    %cst_13 = arith.constant dense<0.000000e+00> : vector<128x128xf32>
    %18 = tpu.matmul %17, %16, %cst_13 {dimension_numbers = #tpu.dot_dimension_numbers<[1], [0], [0], [1], [0, 0, 1, 1], [], []>} : vector<128x64xf32>, vector<64x128xf32>, vector<128x128xf32> -> vector<128x128xf32>
    %c0_14 = arith.constant 0 : index
    %c0_15 = arith.constant 0 : index
    %19 = vector.load %arg7[%c0_14, %c0_15] : memref<128x1xf32, #tpu.memory_space<vmem>>, vector<128x1xf32>
    %20 = vector.broadcast %19 : vector<128x1xf32> to vector<128x128xf32>
    %21 = arith.addf %18, %20 : vector<128x128xf32>
    %cst_16 = arith.constant 0.000000e+00 : f32
    %22 = vector.broadcast %cst_16 : f32 to vector<128x128xf32>
    %23 = arith.maximumf %21, %22 : vector<128x128xf32>
    %c0_17 = arith.constant 0 : index
    %c0_18 = arith.constant 0 : index
    %24 = vector.load %arg8[%c0_17, %c0_18] : memref<32x128xf32, #tpu.memory_space<vmem>>, vector<32x128xf32>
    %cst_19 = arith.constant dense<0.000000e+00> : vector<32x128xf32>
    %25 = tpu.matmul %24, %23, %cst_19 {dimension_numbers = #tpu.dot_dimension_numbers<[1], [0], [0], [1], [0, 0, 1, 1], [], []>} : vector<32x128xf32>, vector<128x128xf32>, vector<32x128xf32> -> vector<32x128xf32>
    %c0_20 = arith.constant 0 : index
    %c0_21 = arith.constant 0 : index
    %26 = vector.load %arg9[%c0_20, %c0_21] : memref<32x1xf32, #tpu.memory_space<vmem>>, vector<32x1xf32>
    %27 = vector.broadcast %26 : vector<32x1xf32> to vector<32x128xf32>
    %28 = arith.addf %25, %27 : vector<32x128xf32>
    %cst_22 = arith.constant 0.000000e+00 : f32
    %29 = vector.broadcast %cst_22 : f32 to vector<32x128xf32>
    %30 = arith.maximumf %28, %29 : vector<32x128xf32>
    %c0_23 = arith.constant 0 : index
    %c0_24 = arith.constant 0 : index
    %31 = vector.load %arg10[%c0_23, %c0_24] : memref<16x32xf32, #tpu.memory_space<vmem>>, vector<16x32xf32>
    %cst_25 = arith.constant dense<0.000000e+00> : vector<16x128xf32>
    %32 = tpu.matmul %31, %30, %cst_25 {dimension_numbers = #tpu.dot_dimension_numbers<[1], [0], [0], [1], [0, 0, 1, 1], [], []>} : vector<16x32xf32>, vector<32x128xf32>, vector<16x128xf32> -> vector<16x128xf32>
    %c0_26 = arith.constant 0 : index
    %c0_27 = arith.constant 0 : index
    %33 = vector.load %arg11[%c0_26, %c0_27] : memref<16x1xf32, #tpu.memory_space<vmem>>, vector<16x1xf32>
    %34 = vector.broadcast %33 : vector<16x1xf32> to vector<16x128xf32>
    %35 = arith.addf %32, %34 : vector<16x128xf32>
    %cst_28 = arith.constant 0.000000e+00 : f32
    %36 = vector.broadcast %cst_28 : f32 to vector<16x128xf32>
    %37 = arith.maximumf %35, %36 : vector<16x128xf32>
    %c0_29 = arith.constant 0 : index
    %c0_30 = arith.constant 0 : index
    %38 = vector.load %arg12[%c0_29, %c0_30] : memref<16x1xf32, #tpu.memory_space<vmem>>, vector<16x1xf32>
    %39 = vector.broadcast %38 : vector<16x1xf32> to vector<16x128xf32>
    %40 = arith.mulf %39, %37 : vector<16x128xf32>
    %cst_31 = arith.constant dense<0.000000e+00> : vector<128xf32>
    %41 = vector.multi_reduction <add>, %40, %cst_31 [0] : vector<16x128xf32> to vector<128xf32>
    %42 = vector.shape_cast %41 : vector<128xf32> to vector<1x128xf32>
    %c0_32 = arith.constant 0 : index
    %c0_33 = arith.constant 0 : index
    %43 = vector.load %arg13[%c0_32, %c0_33] : memref<1x1xf32, #tpu.memory_space<vmem>>, vector<1x1xf32>
    %44 = vector.broadcast %43 : vector<1x1xf32> to vector<1x128xf32>
    %45 = arith.addf %42, %44 : vector<1x128xf32>
    %c0_34 = arith.constant 0 : index
    %c0_35 = arith.constant 0 : index
    %46 = vector.load %arg14[%c0_34, %c0_35] : memref<1x128xf32, #tpu.memory_space<vmem>>, vector<1x128xf32>
    tpu.vector_store %arg14[%c0_34, %c0_35], %45 {strides = array<i32>} : memref<1x128xf32, #tpu.memory_space<vmem>>, vector<1x128xf32>,
    return
  }
  func.func @transform_0(%arg0: i32) -> (i32, i32) {
    %c0_i32 = arith.constant 0 : i32
    %c0_i32_0 = arith.constant 0 : i32
    return %c0_i32, %arg0 : i32, i32
  }
  func.func @transform_1(%arg0: i32) -> (i32, i32) {
    %c0_i32 = arith.constant 0 : i32
    %c0_i32_0 = arith.constant 0 : i32
    %c0_i32_1 = arith.constant 0 : i32
    return %c0_i32, %c0_i32_0 : i32, i32
  }
  func.func @transform_2(%arg0: i32) -> (i32, i32) {
    %c0_i32 = arith.constant 0 : i32
    %c0_i32_0 = arith.constant 0 : i32
    %c0_i32_1 = arith.constant 0 : i32
    return %c0_i32, %c0_i32_0 : i32, i32
  }
  func.func @transform_3(%arg0: i32) -> (i32, i32) {
    %c0_i32 = arith.constant 0 : i32
    %c0_i32_0 = arith.constant 0 : i32
    %c0_i32_1 = arith.constant 0 : i32
    return %c0_i32, %c0_i32_0 : i32, i32
  }
  func.func @transform_4(%arg0: i32) -> (i32, i32) {
    %c0_i32 = arith.constant 0 : i32
    %c0_i32_0 = arith.constant 0 : i32
    %c0_i32_1 = arith.constant 0 : i32
    return %c0_i32, %c0_i32_0 : i32, i32
  }
  func.func @transform_5(%arg0: i32) -> (i32, i32) {
    %c0_i32 = arith.constant 0 : i32
    %c0_i32_0 = arith.constant 0 : i32
    %c0_i32_1 = arith.constant 0 : i32
    return %c0_i32, %c0_i32_0 : i32, i32
  }
  func.func @transform_6(%arg0: i32) -> (i32, i32) {
    %c0_i32 = arith.constant 0 : i32
    %c0_i32_0 = arith.constant 0 : i32
    %c0_i32_1 = arith.constant 0 : i32
    return %c0_i32, %c0_i32_0 : i32, i32
  }
  func.func @transform_7(%arg0: i32) -> (i32, i32) {
    %c0_i32 = arith.constant 0 : i32
    %c0_i32_0 = arith.constant 0 : i32
    %c0_i32_1 = arith.constant 0 : i32
    return %c0_i32, %c0_i32_0 : i32, i32
  }
  func.func @transform_8(%arg0: i32) -> (i32, i32) {
    %c0_i32 = arith.constant 0 : i32
    %c0_i32_0 = arith.constant 0 : i32
    %c0_i32_1 = arith.constant 0 : i32
    return %c0_i32, %c0_i32_0 : i32, i32
  }
  func.func @transform_9(%arg0: i32) -> (i32, i32) {
    %c0_i32 = arith.constant 0 : i32
    %c0_i32_0 = arith.constant 0 : i32
    %c0_i32_1 = arith.constant 0 : i32
    return %c0_i32, %c0_i32_0 : i32, i32
  }
  func.func @transform_10(%arg0: i32) -> (i32, i32) {
    %c0_i32 = arith.constant 0 : i32
    %c0_i32_0 = arith.constant 0 : i32
    %c0_i32_1 = arith.constant 0 : i32
    return %c0_i32, %c0_i32_0 : i32, i32
  }
  func.func @transform_11(%arg0: i32) -> (i32, i32) {
    %c0_i32 = arith.constant 0 : i32
    %c0_i32_0 = arith.constant 0 : i32
    %c0_i32_1 = arith.constant 0 : i32
    return %c0_i32, %c0_i32_0 : i32, i32
  }
  func.func @transform_12(%arg0: i32) -> (i32, i32) {
    %c0_i32 = arith.constant 0 : i32
    %c0_i32_0 = arith.constant 0 : i32
    %c0_i32_1 = arith.constant 0 : i32
    return %c0_i32, %c0_i32_0 : i32, i32
  }
  func.func @transform_13(%arg0: i32) -> (i32, i32) {
    %c0_i32 = arith.constant 0 : i32
    %c0_i32_0 = arith.constant 0 : i32
    return %c0_i32, %arg0 : i32, i32
  }
}

</mosaic_0001>

<bundles_post_ra>
// kernel: tpu_custom_call.1
= control target key start
LH: loop header
LB: loop body
LE: loop exit
PB: predicated region body
PF: predicated region fallthrough
CT: control target
= control target key end

     0   :  { %s1507_s0 = inlined_call_operand.vmem [shape: f32[1,128], index: 0, kind: input, shape index: {}]   ;;  %s1508_s1 = inlined_call_operand.vmem [shape: f32[32,1], index: 1, kind: input, shape index: {}]   ;;  %s1509_s2 = inlined_call_operand.vmem [shape: f32[32,1], index: 2, kind: input, shape index: {}]   ;;  %s1510_s3 = inlined_call_operand.vmem [shape: f32[64,32], index: 3, kind: input, shape index: {}]   ;;  %s1511_s4 = inlined_call_operand.vmem [shape: f32[64,1], index: 4, kind: input, shape index: {}]   ;;  %s1512_s5 = inlined_call_operand.vmem [shape: f32[128,64], index: 5, kind: input, shape index: {}]   ;;  %s1513_s6 = inlined_call_operand.vmem [shape: f32[128,1], index: 6, kind: input, shape index: {}]   ;;  %s1514_s7 = inlined_call_operand.vmem [shape: f32[32,128], index: 7, kind: input, shape index: {}]   ;;  %s1515_s8 = inlined_call_operand.vmem [shape: f32[32,1], index: 8, kind: input, shape index: {}]   ;;  %s1516_s9 = inlined_call_operand.vmem [shape: f32[16,32], index: 9, kind: input, shape index: {}]   ;;  %s1517_s10 = inlined_call_operand.vmem [shape: f32[16,1], index: 10, kind: input, shape index: {}]   ;;  %s1518_s11 = inlined_call_operand.vmem [shape: f32[16,1], index: 11, kind: input, shape index: {}]   ;;  %s1519_s12 = inlined_call_operand.<no memory space> [shape: f32[1,1], index: 12, kind: input, shape index: {}]   ;;  %s1520_s13 = inlined_call_operand.hbm [shape: f32[1,128], index: 13, kind: output, shape index: {}]  }
   0x1   :  { %v18_v0 = vstv %s1519_s12 }
   0x2   :  { %19 = vst [vmem:[#allocation2] sm:$0x1] %v18_v0 }
   0x3   :  { %v82_v1 = vld [vmem:[%s1509_s2] sm:$0xff]  ;;  %v1181_v3 = vmov 0   ;;  %v83_v4 = vld [vmem:[%s1509_s2 + $0x8] sm:$0xff]  ;;  %v51_v6 = vld [vmem:[%s1508_s1 + $0x18] sm:$0xff] }
   0x4   :  { %v48_v2 = vld [vmem:[%s1508_s1] sm:$0xff]  ;;  %1156 = vset.pattern.permute.xlu1 %v1181_v3  ;;  %1155 = vset.pattern.permute.xlu0 %v1181_v3  ;;  %v49_v5 = vld [vmem:[%s1508_s1 + $0x8] sm:$0xff]  ;;  %v50_v7 = vld [vmem:[%s1508_s1 + $0x10] sm:$0xff] }
   0x5   :  { %88 = vperm.xlu1 %1156, %v82_v1   ;;  %54 = vperm.xlu0 %1155, %v48_v2   ;;  %v85_v8 = vld [vmem:[%s1509_s2 + $0x18] sm:$0xff]  ;;  %v84_v9 = vld [vmem:[%s1509_s2 + $0x10] sm:$0xff] }
   0x9   :  { %93 = vperm.xlu1 %1156, %v83_v4   ;;  %59 = vperm.xlu0 %1155, %v49_v5  }
   0xd   :  { %69 = vperm.xlu1 %1156, %v51_v6   ;;  %64 = vperm.xlu0 %1155, %v50_v7  }
  0x11   :  { %103 = vperm.xlu1 %1156, %v85_v8   ;;  %98 = vperm.xlu0 %1155, %v84_v9  }
  0x12   :  { %20 = vsyncpa [#allocation4], 0  ;;  %v123_v10 = vld [vmem:[%s1511_s4 + $0x8] sm:$0xff]  ;;  %v122_v11 = vld [vmem:[%s1511_s4] sm:$0xff]  ;;  %vm170_vm0 = vcmask 261120   ;;  %vm420_vm1 = vcmask 523264  }
  0x13   :  { %v125_v12 = vld [vmem:[%s1511_s4 + $0x18] sm:$0xff]  ;;  %v124_v13 = vld [vmem:[%s1511_s4 + $0x10] sm:$0xff]  ;;  %v114_v14 = vld [vmem:[%s1510_s3] sm:$0xff] }
  0x14   :  { %v127_v15 = vld [vmem:[%s1511_s4 + $0x28] sm:$0xff]  ;;  %v126_v16 = vld [vmem:[%s1511_s4 + $0x20] sm:$0xff]  ;;  %988 = vmatprep.mubr.msk.f32.mxu0 %vm170_vm0, %v114_v14  ;;  %v129_v17 = vld [vmem:[%s1511_s4 + $0x38] sm:$0xff] }
  0x15   :  { %137 = vperm.xlu1 %1156, %v123_v10   ;;  %132 = vperm.xlu0 %1155, %v122_v11   ;;  %v128_v18 = vld [vmem:[%s1511_s4 + $0x30] sm:$0xff]  ;;  %v325_v19 = vld [vmem:[%s1513_s6 + $0x8] sm:$0xff]  ;;  %v324_v20 = vld [vmem:[%s1513_s6] sm:$0xff] }
  0x16   :  { %v327_v21 = vld [vmem:[%s1513_s6 + $0x18] sm:$0xff]  ;;  %v326_v22 = vld [vmem:[%s1513_s6 + $0x10] sm:$0xff]  ;;  %v329_v23 = vld [vmem:[%s1513_s6 + $0x28] sm:$0xff] }
  0x17   :  { %v328_v24 = vld [vmem:[%s1513_s6 + $0x20] sm:$0xff]  ;;  %v331_v25 = vld [vmem:[%s1513_s6 + $0x38] sm:$0xff]  ;;  %v330_v26 = vld [vmem:[%s1513_s6 + $0x30] sm:$0xff] }
  0x18   :  { %v333_v27 = vld [vmem:[%s1513_s6 + $0x48] sm:$0xff]  ;;  %v332_v28 = vld [vmem:[%s1513_s6 + $0x40] sm:$0xff]  ;;  %v335_v29 = vld [vmem:[%s1513_s6 + $0x58] sm:$0xff] }
  0x19   :  { %147 = vperm.xlu1 %1156, %v125_v12   ;;  %142 = vperm.xlu0 %1155, %v124_v13   ;;  %v334_v30 = vld [vmem:[%s1513_s6 + $0x50] sm:$0xff]  ;;  %v337_v31 = vld [vmem:[%s1513_s6 + $0x68] sm:$0xff]  ;;  %v336_v32 = vld [vmem:[%s1513_s6 + $0x60] sm:$0xff] }
  0x1a   :  { %v339_v33 = vld [vmem:[%s1513_s6 + $0x78] sm:$0xff]  ;;  %v338_v34 = vld [vmem:[%s1513_s6 + $0x70] sm:$0xff]  ;;  %v635_v35 = vld [vmem:[%s1515_s8 + $0x8] sm:$0xff] }
  0x1b   :  { %v634_v36 = vld [vmem:[%s1515_s8] sm:$0xff]  ;;  %v637_v37 = vld [vmem:[%s1515_s8 + $0x18] sm:$0xff]  ;;  %v636_v38 = vld [vmem:[%s1515_s8 + $0x10] sm:$0xff] }
  0x1c   :  { %v750_v39 = vld [vmem:[%s1517_s10 + $0x8] sm:$0xff]  ;;  %v749_v40 = vld [vmem:[%s1517_s10] sm:$0xff]  ;;  %v116_v4 = vld [vmem:[%s1510_s3 + $0x10] sm:$0xff] }
  0x1d   :  { %157 = vperm.xlu1 %1156, %v127_v15   ;;  %152 = vperm.xlu0 %1155, %v126_v16   ;;  %v845_v41 = vld [vmem:[%s1518_s11 + $0x8] sm:$0xff]  ;;  %v844_v42 = vld [vmem:[%s1518_s11] sm:$0xff]  ;;  %v117_v5 = vld [vmem:[%s1510_s3 + $0x18] sm:$0xff] }
  0x1e   :  { %v865_v43 = vld [vmem:[#allocation2] sm:$0x1]  ;;  %v115_v3 = vld [vmem:[%s1510_s3 + $0x8] sm:$0xff]  ;;  %v120_v8 = vld [vmem:[%s1510_s3 + $0x30] sm:$0xff] }
  0x1f   :  { %v891_v44 = vld [vmem:[%s1507_s0] ss:$0 sm:$0xff]  ;;  %v119_v7 = vld [vmem:[%s1510_s3 + $0x28] sm:$0xff]  ;;  %v121_v9 = vld [vmem:[%s1510_s3 + $0x38] sm:$0xff] }
  0x20   :  { %v118_v6 = vld [vmem:[%s1510_s3 + $0x20] sm:$0xff] }
  0x21   :  { %167 = vperm.xlu1 %1156, %v129_v17   ;;  %162 = vperm.xlu0 %1155, %v128_v18   ;;  %v308_v10 = vld [vmem:[%s1512_s5] sm:$0xff] }
  0x22   :  { %1016 = vmatprep.mubr.msk.f32.mxu1 %vm420_vm1, %v308_v10 }
  0x25   :  { %347 = vperm.xlu1 %1156, %v325_v19   ;;  %342 = vperm.xlu0 %1155, %v324_v20  }
  0x29   :  { %357 = vperm.xlu1 %1156, %v327_v21   ;;  %352 = vperm.xlu0 %1155, %v326_v22  }
  0x2d   :  { %367 = vperm.xlu1 %1156, %v329_v23   ;;  %362 = vperm.xlu0 %1155, %v328_v24  }
  0x31   :  { %377 = vperm.xlu1 %1156, %v331_v25   ;;  %372 = vperm.xlu0 %1155, %v330_v26  }
  0x35   :  { %387 = vperm.xlu1 %1156, %v333_v27   ;;  %382 = vperm.xlu0 %1155, %v332_v28  }
  0x39   :  { %397 = vperm.xlu1 %1156, %v335_v29   ;;  %392 = vperm.xlu0 %1155, %v334_v30  }
  0x3d   :  { %407 = vperm.xlu1 %1156, %v337_v31   ;;  %402 = vperm.xlu0 %1155, %v336_v32  }
  0x41   :  { %417 = vperm.xlu1 %1156, %v339_v33   ;;  %412 = vperm.xlu0 %1155, %v338_v34  }
  0x45   :  { %645 = vperm.xlu1 %1156, %v635_v35   ;;  %640 = vperm.xlu0 %1155, %v634_v36  }
  0x49   :  { %655 = vperm.xlu1 %1156, %v637_v37   ;;  %650 = vperm.xlu0 %1155, %v636_v38  }
  0x4d   :  { %758 = vperm.xlu1 %1156, %v750_v39   ;;  %753 = vperm.xlu0 %1155, %v749_v40  }
  0x51   :  { %853 = vperm.xlu1 %1156, %v845_v41   ;;  %848 = vperm.xlu0 %1155, %v844_v42  }
  0x55   :  { %868 = vperm.xlu0 %1155, %v865_v43  }
  0x84   :  { %v89_v45 = vpop.permute.xlu1 %88  ;;  %v55_v46 = vpop.permute.xlu0 %54 }
  0x85   :  { %v78_v47 = vmul.f32 %v891_v44, %v55_v46 }
  0x87   :  { %v106_v50 = vadd.f32 %v89_v45, %v78_v47  ;;  %v309_v47 = vld [vmem:[%s1512_s5 + $0x8] sm:$0xff] }
  0x88   :  { %v94_v48 = vpop.permute.xlu1 %93  ;;  %v60_v49 = vpop.permute.xlu0 %59 }
  0x89   :  { %v79_v51 = vmul.f32 %v891_v44, %v60_v49  ;;  %v110_v55 = vmax.f32 %v106_v50, 0.0  ;;  %v311_v49 = vld [vmem:[%s1512_s5 + $0x18] sm:$0xff]  ;;  %v312_v50 = vld [vmem:[%s1512_s5 + $0x20] sm:$0xff] }
  0x8b   :  { %v107_v52 = vadd.f32 %v94_v48, %v79_v51  ;;  %v310_v48 = vld [vmem:[%s1512_s5 + $0x10] sm:$0xff]  ;;  %v313_v51 = vld [vmem:[%s1512_s5 + $0x28] sm:$0xff] }
  0x8c   :  { %v70_v53 = vpop.permute.xlu1 %69  ;;  %v65_v54 = vpop.permute.xlu0 %64 }
  0x8d   :  { %v111_v56 = vmax.f32 %v107_v52, 0.0  ;;  %v81_v57 = vmul.f32 %v891_v44, %v70_v53  ;;  %v80_v58 = vmul.f32 %v891_v44, %v65_v54  ;;  %v314_v52 = vld [vmem:[%s1512_s5 + $0x30] sm:$0xff]  ;;  %v315_v53 = vld [vmem:[%s1512_s5 + $0x38] sm:$0xff]  ;;  %v316_v54 = vld [vmem:[%s1512_s5 + $0x40] sm:$0xff] }
  0x8f   :  { %v1089_v59 = vpack.c.bf16 %v111_v56, %v110_v55  ;;  %v317_v55 = vld [vmem:[%s1512_s5 + $0x48] sm:$0xff]  ;;  %v318_v56 = vld [vmem:[%s1512_s5 + $0x50] sm:$0xff] }
  0x90   :  { %v104_v60 = vpop.permute.xlu1 %103  ;;  %v99_v61 = vpop.permute.xlu0 %98 }
  0x91   :  { %v109_v62 = vadd.f32 %v104_v60, %v81_v57  ;;  %v108_v63 = vadd.f32 %v99_v61, %v80_v58  ;;  %1090 = vmatprep.subr.bf16.mxu0 %v1089_v59  ;;  %v319_v57 = vld [vmem:[%s1512_s5 + $0x58] sm:$0xff]  ;;  %v320_v58 = vld [vmem:[%s1512_s5 + $0x60] sm:$0xff]  ;;  %v322_v60 = vld [vmem:[%s1512_s5 + $0x70] sm:$0xff] }
  0x92   :  { %1092 = vmatpush3.bf16.msra.mxu0 %v1089_v59  ;;  %v321_v59 = vld [vmem:[%s1512_s5 + $0x68] sm:$0xff]  ;;  %v323_v61 = vld [vmem:[%s1512_s5 + $0x78] sm:$0xff] }
  0x93   :  { %v113_v0 = vmax.f32 %v109_v62, 0.0  ;;  %v112_v1 = vmax.f32 %v108_v63, 0.0  ;;  %v630_v62 = vld [vmem:[%s1514_s7] sm:$0xff] }
  0x94   :  { %v138_v11 = vpop.permute.xlu1 %137  ;;  %v133_v12 = vpop.permute.xlu0 %132 }
  0x95   :  { %v1093_v2 = vpack.c.bf16 %v113_v0, %v112_v1 }
  0x97   :  { %1094 = vmatprep.subr.bf16.mxu0 %v1093_v2 }
  0x98   :  { %1096 = vmatpush3.bf16.msra.mxu0 %v1093_v2  ;;  %v148_v13 = vpop.permute.xlu1 %147  ;;  %v143_v15 = vpop.permute.xlu0 %142 }
  0x9b   :  { %989 = vmatmul.mubr.msk.f32.vlgmr.msra.gmra.mrb[0].mxu0 %vm170_vm0, %v115_v3 }
  0x9c   :  { %991 = vmatprep.mubr.msk.f32.mxu0 %vm170_vm0, %v116_v4  ;;  %v158_v24 = vpop.permute.xlu1 %157  ;;  %v153_v27 = vpop.permute.xlu0 %152 }
  0x9f   :  { %992 = vmatmul.mubr.msk.f32.gmra.mrb[2].mxu0 %vm170_vm0, %v117_v5 }
  0xa0   :  { %994 = vmatprep.mubr.msk.f32.mxu0 %vm170_vm0, %v118_v6  ;;  %v168_v36 = vpop.permute.xlu1 %167  ;;  %v163_v39 = vpop.permute.xlu0 %162 }
  0xa3   :  { %995 = vmatmul.mubr.msk.f32.gmra.mrb[4].mxu0 %vm170_vm0, %v119_v7 }
  0xa4   :  { %997 = vmatprep.mubr.msk.f32.mxu0 %vm170_vm0, %v120_v8  ;;  %v348_v63 = vpop.permute.xlu1 %347  ;;  %v343_v0 = vpop.permute.xlu0 %342 }
  0xa7   :  { %998 = vmatmul.mubr.msk.f32.gmra.mrb[6].mxu0 %vm170_vm0, %v121_v9 }
  0xa8   :  { %1072 = vmatprep.mubr.f32.mxu0 %v630_v62  ;;  %v358_v1 = vpop.permute.xlu1 %357  ;;  %v353_v2 = vpop.permute.xlu0 %352 }
  0xac   :  { %v368_v3 = vpop.permute.xlu1 %367  ;;  %v363_v4 = vpop.permute.xlu0 %362 }
  0xb0   :  { %v378_v10 = vpop.permute.xlu1 %377 }
 0x16e   :  { %v990_v14 = vpop.f32.mrb[0].mxu0 }
 0x16f   :  { %v267_v16 = vadd.f32 %v990_v14, %v138_v11  ;;  %v261_v17 = vpop.f32.mrb[1].mxu0 }
 0x170   :  { %v262_v18 = vadd.f32 %v261_v17, %v133_v12 }
 0x171   :  { %v301_v19 = vmax.f32 %v267_v16, 0.0 }
 0x172   :  { %v300_v20 = vmax.f32 %v262_v18, 0.0  ;;  %v993_v21 = vpop.f32.mrb[2].mxu0 }
 0x173   :  { %v277_v22 = vadd.f32 %v993_v21, %v148_v13  ;;  %v271_v23 = vpop.f32.mrb[3].mxu0  ;;  %v373_v13 = vpop.permute.xlu0 %372 }
 0x174   :  { %v272_v25 = vadd.f32 %v271_v23, %v143_v15  ;;  %v1097_v26 = vpack.c.bf16 %v301_v19, %v300_v20  ;;  %v388_v23 = vpop.permute.xlu1 %387 }
 0x175   :  { %v303_v28 = vmax.f32 %v277_v22, 0.0 }
 0x176   :  { %v302_v29 = vmax.f32 %v272_v25, 0.0  ;;  %v996_v30 = vpop.f32.mrb[4].mxu0  ;;  %1098 = vmatprep.subr.bf16.mxu1 %v1097_v26 }
 0x177   :  { %v287_v31 = vadd.f32 %v996_v30, %v158_v24  ;;  %v281_v32 = vpop.f32.mrb[5].mxu0  ;;  %1100 = vmatpush3.bf16.msra.mxu1 %v1097_v26  ;;  %v383_v26 = vpop.permute.xlu0 %382 }
 0x178   :  { %v1101_v33 = vpack.c.bf16 %v303_v28, %v302_v29  ;;  %v282_v34 = vadd.f32 %v281_v32, %v153_v27 }
 0x179   :  { %v305_v35 = vmax.f32 %v287_v31, 0.0 }
 0x17a   :  { %v304_v37 = vmax.f32 %v282_v34, 0.0  ;;  %v999_v38 = vpop.f32.mrb[6].mxu0  ;;  %1102 = vmatprep.subr.bf16.mxu1 %v1101_v33 }
 0x17b   :  { %v297_v40 = vadd.f32 %v999_v38, %v168_v36  ;;  %v291_v41 = vpop.f32.mrb[7].mxu0  ;;  %1104 = vmatpush3.bf16.msra.mxu1 %v1101_v33  ;;  %v393_v38 = vpop.permute.xlu0 %392 }
 0x17c   :  { %v1105_v42 = vpack.c.bf16 %v305_v35, %v304_v37  ;;  %v292_v43 = vadd.f32 %v291_v41, %v163_v39  ;;  %v398_v35 = vpop.permute.xlu1 %397 }
 0x17d   :  { %v307_v44 = vmax.f32 %v297_v40, 0.0 }
 0x17e   :  { %v306_v45 = vmax.f32 %v292_v43, 0.0  ;;  %1106 = vmatprep.subr.bf16.mxu1 %v1105_v42 }
 0x17f   :  { %1108 = vmatpush3.bf16.msra.mxu1 %v1105_v42 }
 0x180   :  { %v1109_v46 = vpack.c.bf16 %v307_v44, %v306_v45 }
 0x182   :  { %1110 = vmatprep.subr.bf16.mxu1 %v1109_v46 }
 0x183   :  { %1112 = vmatpush3.bf16.msra.mxu1 %v1109_v46 }
 0x186   :  { %1017 = vmatmul.mubr.msk.f32.vlgmr.msra.gmra.mrb[0].mxu1 %vm420_vm1, %v309_v47 }
 0x187   :  { %1019 = vmatprep.mubr.msk.f32.mxu1 %vm420_vm1, %v310_v48  ;;  %v408_v48 = vpop.permute.xlu1 %407 }
 0x18a   :  { %1020 = vmatmul.mubr.msk.f32.gmra.mrb[2].mxu1 %vm420_vm1, %v311_v49 }
 0x18b   :  { %1022 = vmatprep.mubr.msk.f32.mxu1 %vm420_vm1, %v312_v50 }
 0x18e   :  { %1023 = vmatmul.mubr.msk.f32.gmra.mrb[4].mxu1 %vm420_vm1, %v313_v51  ;;  %v403_v51 = vpop.permute.xlu0 %402 }
 0x18f   :  { %1025 = vmatprep.mubr.msk.f32.mxu1 %vm420_vm1, %v314_v52 }
 0x192   :  { %1026 = vmatmul.mubr.msk.f32.gmra.mrb[6].mxu1 %vm420_vm1, %v315_v53 }
 0x193   :  { %1028 = vmatprep.mubr.msk.f32.mxu1 %vm420_vm1, %v316_v54 }
 0x196   :  { %1029 = vmatmul.mubr.msk.f32.gmra.mrb[8].mxu1 %vm420_vm1, %v317_v55 }
 0x197   :  { %1031 = vmatprep.mubr.msk.f32.mxu1 %vm420_vm1, %v318_v56 }
 0x19a   :  { %1032 = vmatmul.mubr.msk.f32.gmra.mrb[10].mxu1 %vm420_vm1, %v319_v57 }
 0x19b   :  { %1034 = vmatprep.mubr.msk.f32.mxu1 %vm420_vm1, %v320_v58 }
 0x19e   :  { %1035 = vmatmul.mubr.msk.f32.gmra.mrb[12].mxu1 %vm420_vm1, %v321_v59 }
 0x19f   :  { %1037 = vmatprep.mubr.msk.f32.mxu1 %vm420_vm1, %v322_v60  ;;  %v418_v60 = vpop.permute.xlu1 %417 }
 0x1a2   :  { %1038 = vmatmul.mubr.msk.f32.gmra.mrb[14].mxu1 %vm420_vm1, %v323_v61 }
 0x259   :  { %v1018_v5 = vpop.f32.mrb[0].mxu1 }
 0x25a   :  { %v541_v6 = vadd.f32 %v1018_v5, %v348_v63  ;;  %v535_v7 = vpop.f32.mrb[1].mxu1  ;;  %v413_v63 = vpop.permute.xlu0 %412 }
 0x25b   :  { %v536_v8 = vadd.f32 %v535_v7, %v343_v0  ;;  %v631_v7 = vld [vmem:[%s1514_s7 + $0x8] sm:$0xff] }
 0x25c   :  { %v615_v9 = vmax.f32 %v541_v6, 0.0 }
 0x25d   :  { %v614_v11 = vmax.f32 %v536_v8, 0.0  ;;  %v1021_v12 = vpop.f32.mrb[2].mxu1  ;;  %v632_v8 = vld [vmem:[%s1514_s7 + $0x10] sm:$0xff] }
 0x25e   :  { %v551_v14 = vadd.f32 %v1021_v12, %v358_v1  ;;  %v545_v15 = vpop.f32.mrb[3].mxu1  ;;  %v641_v12 = vpop.permute.xlu0 %640 }
 0x25f   :  { %v1113_v16 = vpack.c.bf16 %v615_v9, %v614_v11  ;;  %v546_v17 = vadd.f32 %v545_v15, %v353_v2  ;;  %v633_v9 = vld [vmem:[%s1514_s7 + $0x18] sm:$0xff]  ;;  %v646_v11 = vpop.permute.xlu1 %645 }
 0x260   :  { %v617_v18 = vmax.f32 %v551_v14, 0.0 }
 0x261   :  { %v616_v19 = vmax.f32 %v546_v17, 0.0  ;;  %v1024_v20 = vpop.f32.mrb[4].mxu1  ;;  %1114 = vmatprep.subr.bf16.mxu0 %v1113_v16 }
 0x262   :  { %v561_v21 = vadd.f32 %v1024_v20, %v368_v3  ;;  %v555_v22 = vpop.f32.mrb[5].mxu1  ;;  %1116 = vmatpush3.bf16.msra.mxu0 %v1113_v16 }
 0x263   :  { %v1117_v24 = vpack.c.bf16 %v617_v18, %v616_v19  ;;  %v556_v25 = vadd.f32 %v555_v22, %v363_v4  ;;  %v656_v18 = vpop.permute.xlu1 %655 }
 0x264   :  { %v619_v27 = vmax.f32 %v561_v21, 0.0  ;;  %v651_v21 = vpop.permute.xlu0 %650 }
 0x265   :  { %v618_v28 = vmax.f32 %v556_v25, 0.0  ;;  %v1027_v29 = vpop.f32.mrb[6].mxu1  ;;  %1118 = vmatprep.subr.bf16.mxu0 %v1117_v24 }
 0x266   :  { %v571_v30 = vadd.f32 %v1027_v29, %v378_v10  ;;  %v565_v31 = vpop.f32.mrb[7].mxu1  ;;  %1120 = vmatpush3.bf16.msra.mxu0 %v1117_v24  ;;  %v747_v10 = vld [vmem:[%s1516_s9] sm:$0xff]  ;;  %v748_v29 = vld [vmem:[%s1516_s9 + $0x8] sm:$0xff]  ;;  %s1182_s9 = smov [#allocation3]  }
 0x267   :  { %v1121_v32 = vpack.c.bf16 %v619_v27, %v618_v28  ;;  %v566_v33 = vadd.f32 %v565_v31, %v373_v13  ;;  %s883_s11 = sshll.u32 %s1182_s9, 4  ;;  %s884_s11 = int_to_ptr.vmem [resolvable:$true] %s883_s11 }
 0x268   :  { %v621_v34 = vmax.f32 %v571_v30, 0.0  ;;  %v759_v30 = vpop.permute.xlu1 %758  ;;  %v754_v31 = vpop.permute.xlu0 %753  ;;  %s1157_s1 = scalar_lea.vmem %s884_s11, 16  ;;  %s1161_s29 = scalar_lea.vmem %s884_s11, 32 }
 0x269   :  { %v620_v36 = vmax.f32 %v566_v33, 0.0  ;;  %v1030_v37 = vpop.f32.mrb[8].mxu1  ;;  %1122 = vmatprep.subr.bf16.mxu0 %v1121_v32  ;;  %p1158_p0 = scmp.ne.s32.totalorder %s884_s11, %s1157_s1  ;;  %p1162_p1 = scmp.lt.s32.totalorder %s884_s11, %s884_s11 }
 0x26a   :  { %v581_v39 = vadd.f32 %v1030_v37, %v388_v23  ;;  %v575_v40 = vpop.f32.mrb[9].mxu1  ;;  %1124 = vmatpush3.bf16.msra.mxu0 %v1121_v32  ;;  %p1163_p2 = scmp.lt.s32.totalorder %s1161_s29, %s1157_s1 }
 0x26b   :  { %v1125_v41 = vpack.c.bf16 %v621_v34, %v620_v36  ;;  %v576_v42 = vadd.f32 %v575_v40, %v383_v26 }
 0x26c   :  { %v623_v43 = vmax.f32 %v581_v39, 0.0  ;;  %v854_v37 = vpop.permute.xlu1 %853  ;;  %v849_v39 = vpop.permute.xlu0 %848  ;;  %p1164_p3 = por %p1163_p2, %p1162_p1 }
 0x26d   :  { %v622_v44 = vmax.f32 %v576_v42, 0.0  ;;  %v1033_v45 = vpop.f32.mrb[10].mxu1  ;;  %1126 = vmatprep.subr.bf16.mxu0 %v1125_v41  ;;  %v871_v42 = vlaneseq }
 0x26e   :  { %v591_v46 = vadd.f32 %v1033_v45, %v398_v35  ;;  %v585_v47 = vpop.f32.mrb[11].mxu1  ;;  %1128 = vmatpush3.bf16.msra.mxu0 %v1125_v41  ;;  %p1165_p4 = pnand %p1164_p3, %p1158_p0 }
 0x26f   :  { %v1129_v49 = vpack.c.bf16 %v623_v43, %v622_v44  ;;  %v586_v50 = vadd.f32 %v585_v47, %v393_v38  ;;  %v872_v45 = vshrl.u32 %v871_v42, 7 }
 0x270   :  { %v625_v52 = vmax.f32 %v591_v46, 0.0 }
 0x271   :  { %v624_v53 = vmax.f32 %v586_v50, 0.0  ;;  %v1036_v54 = vpop.f32.mrb[12].mxu1  ;;  %1130 = vmatprep.subr.bf16.mxu0 %v1129_v49  ;;  %v869_v50 = vpop.permute.xlu0 %868 }
 0x272   :  { %v601_v55 = vadd.f32 %v1036_v54, %v408_v48  ;;  %v595_v56 = vpop.f32.mrb[13].mxu1  ;;  %1132 = vmatpush3.bf16.msra.mxu0 %v1129_v49  ;;  %v873_v48 = vsub.s32 0, %v872_v45 }
 0x273   :  { %v1133_v57 = vpack.c.bf16 %v625_v52, %v624_v53  ;;  %v596_v58 = vadd.f32 %v595_v56, %v403_v51 }
 0x274   :  { %v627_v59 = vmax.f32 %v601_v55, 0.0  ;;  %v874_v52 = vrot.slane %v869_v50, %v873_v48 }
 0x275   :  { %v626_v61 = vmax.f32 %v596_v58, 0.0  ;;  %v1039_v62 = vpop.f32.mrb[14].mxu1  ;;  %1134 = vmatprep.subr.bf16.mxu0 %v1133_v57 }
 0x276   :  { %v611_v0 = vadd.f32 %v1039_v62, %v418_v60  ;;  %v605_v1 = vpop.f32.mrb[15].mxu1  ;;  %1136 = vmatpush3.bf16.msra.mxu0 %v1133_v57 }
 0x277   :  { %v1137_v2 = vpack.c.bf16 %v627_v59, %v626_v61  ;;  %v606_v3 = vadd.f32 %v605_v1, %v413_v63 }
 0x278   :  { %v629_v4 = vmax.f32 %v611_v0, 0.0 }
 0x279   :  { %v628_v5 = vmax.f32 %v606_v3, 0.0  ;;  %1138 = vmatprep.subr.bf16.mxu0 %v1137_v2 }
 0x27a   :  { %1140 = vmatpush3.bf16.msra.mxu0 %v1137_v2 }
 0x27b   :  { %v1141_v6 = vpack.c.bf16 %v629_v4, %v628_v5 }
 0x27d   :  { %1142 = vmatprep.subr.bf16.mxu0 %v1141_v6 }
 0x27e   :  { %1144 = vmatpush3.bf16.msra.mxu0 %v1141_v6 }
 0x281   :  { %1073 = vmatmul.mubr.f32.vlgmr.msra.gmra.mrb[8].mxu0 %v631_v7 }
 0x282   :  { %1075 = vmatprep.mubr.f32.mxu0 %v632_v8 }
 0x285   :  { %1076 = vmatmul.mubr.f32.gmra.mrb[10].mxu0 %v633_v9 }
 0x286   :  { %1086 = vmatprep.mubr.msk.f32.mxu0 %vm170_vm0, %v747_v10 }
 0x354   :  { %v1074_v13 = vpop.f32.mrb[8].mxu0 }
 0x355   :  { %v730_v14 = vadd.f32 %v1074_v13, %v646_v11  ;;  %v724_v15 = vpop.f32.mrb[9].mxu0 }
 0x356   :  { %v725_v16 = vadd.f32 %v724_v15, %v641_v12 }
 0x357   :  { %v744_v17 = vmax.f32 %v730_v14, 0.0 }
 0x358   :  { %v743_v19 = vmax.f32 %v725_v16, 0.0  ;;  %v1077_v20 = vpop.f32.mrb[10].mxu0 }
 0x359   :  { %v740_v22 = vadd.f32 %v1077_v20, %v656_v18  ;;  %v734_v23 = vpop.f32.mrb[11].mxu0 }
 0x35a   :  { %v1145_v24 = vpack.c.bf16 %v744_v17, %v743_v19  ;;  %v735_v25 = vadd.f32 %v734_v23, %v651_v21 }
 0x35b   :  { %v746_v26 = vmax.f32 %v740_v22, 0.0 }
 0x35c   :  { %v745_v27 = vmax.f32 %v735_v25, 0.0  ;;  %1146 = vmatprep.subr.bf16.mxu0 %v1145_v24 }
 0x35d   :  { %1148 = vmatpush3.bf16.msra.mxu0 %v1145_v24 }
 0x35e   :  { %v1149_v28 = vpack.c.bf16 %v746_v26, %v745_v27 }
 0x360   :  { %1150 = vmatprep.subr.bf16.mxu0 %v1149_v28 }
 0x361   :  { %1152 = vmatpush3.bf16.msra.mxu0 %v1149_v28 }
 0x364   :  { %1087 = vmatmul.mubr.msk.f32.vlgmr.msra.gmra.mrb[12].mxu0 %vm170_vm0, %v748_v29 }
 0x437   :  { %v1088_v32 = vpop.f32.mrb[12].mxu0 }
 0x438   :  { %v839_v33 = vadd.f32 %v1088_v32, %v759_v30  ;;  %v833_v34 = vpop.f32.mrb[13].mxu0 }
 0x439   :  { %v834_v35 = vadd.f32 %v833_v34, %v754_v31 }
 0x43a   :  { %v843_v36 = vmax.f32 %v839_v33, 0.0 }
 0x43b   :  { %v842_v38 = vmax.f32 %v834_v35, 0.0 }
 0x43c   :  { %v857_v40 = vmul.f32 %v854_v37, %v843_v36 }
 0x43d   :  { %v856_v41 = vmul.f32 %v849_v39, %v842_v38 }
 0x43f   :  { %v858_v43 = vadd.f32 %v857_v40, %v856_v41 }
 0x441   :  { %v859_v44 = vrot.slane %v858_v43, 4 }
 0x443   :  { %v860_v46 = vadd.f32 %v859_v44, %v858_v43 }
 0x445   :  { %v861_v47 = vrot.slane %v860_v46, 2 }
 0x447   :  { %v862_v49 = vadd.f32 %v861_v47, %v860_v46 }
 0x449   :  { %v863_v51 = vrot.slane %v862_v49, 1 }
 0x44b   :  { %v864_v53 = vadd.f32 %v863_v51, %v862_v49 }
 0x44d   :  { %v875_v54 = vadd.f32 %v874_v52, %v864_v53 }
 0x44f   :  { %876 = vst [vmem:[#allocation3] sm:$0x1] %v875_v54 }
 0x450   :  { %1168 = shalt.err (!%p1165_p4)
}
 0x451   :  { %s1169_s14 = scalar_lea.hbm %s1520_s13, 16 }
 0x452   :  { %p1170_p5 = scmp.ne.s32.totalorder %s1520_s13, %s1169_s14  ;;  %p1173_p6 = scmp.lt.u32.totalorder %s1169_s14, %s1520_s13 }
 0x454   :  { %p1175_p7 = pnand %p1173_p6, %p1170_p5 }
 0x456   :  { %1178 = shalt.err (!%p1175_p7)
}
 0x457   :  { %886 = dma.vmem_to_hbm [thread:$0]  %s884_s11, 16, %s1520_s13, [#allocation4]  }
 0x458   :  { %1179 = dma.done.wait [#allocation4], 16  }
 0x459   :  { %1180 = vsyncadd [#allocation4], 4294967280 }
 0x45a   :  { %890 = vsyncpa [#allocation4], 1 }

</bundles_post_ra>
